<compile_context>
chip_gen: v6e
topology: v6e:2x2x1
jax: 0.10.0
libtpu: 0.0.40
codegen_flags: <defaults>
</compile_context>

<pallas_src>
import numpy as np
import jax
import jax.numpy as jnp
from jax.experimental import pallas as pl
from jax.experimental.pallas import tpu as pltpu

NUM_CLASSES = 4
LANE = 128  # lane-dense padded classifier width
SUB = 8     # f32 sublane count (row padding)


# ------------------------------ fused expert / combine kernel ------------------------------

def moe_fused_kernel(feat_ref, gate_blk_ref, gsm_ref, comb_ref,
                     wp_ref, bp_ref, wcs_ref, bcs_ref, out_ref):
    """All E experts' pooler + classifier + gate-weighted combine, no loops, no branches.

    feat_ref     : VMEM f32 [R, H]        slot-major pooled features (rows >= 2B are zero)
    gate_blk_ref : VMEM f32 [R, E*H]      normalized gate weight broadcast over each expert's
                                          H-column block (zero for unselected experts / pad rows)
    gsm_ref      : VMEM f32 [R, 8]        normalized gate weight per (row, expert), expert-padded
    comb_ref     : VMEM f32 [R, R]        constant slot-sum matrix: out[b] = logits[b]+logits[B+b]
    wp_ref       : VMEM f32 [H, E*H]      hstack of per-expert pooler weights
    bp_ref       : VMEM f32 [R, E*H]      pooler bias, row-replicated
    wcs_ref      : VMEM f32 [E*H, LANE]   vstack of per-expert classifier weights (C -> LANE pad)
    bcs_ref      : VMEM f32 [8, LANE]     per-expert classifier bias (expert + lane padded)
    out_ref      : VMEM f32 [R, LANE]
    """
    # pooler for ALL experts in one lane-dense matmul (N = E*H = 128)
    pooled = jnp.tanh(
        jnp.dot(feat_ref[...], wp_ref[...], preferred_element_type=jnp.float32)
        + bp_ref[...])
    # fold normalized gate weights into the expert column blocks (one VPU mul)
    scaled = pooled * gate_blk_ref[...]
    # stacked classifier (K = E*H = 128) + gate-weighted classifier bias
    logits = (jnp.dot(scaled, wcs_ref[...], preferred_element_type=jnp.float32)
              + jnp.dot(gsm_ref[...], bcs_ref[...], preferred_element_type=jnp.float32))
    # sum the two top-k slot rows per sample; single unmasked [R, LANE] store
    out_ref[...] = jnp.dot(comb_ref[...], logits, preferred_element_type=jnp.float32)


def moe_combine(feat_pad, gate_blk, gsm, comb, wp_fused, bp_fused, wc_stack, bc_stack):
    R = feat_pad.shape[0]
    # Single kernel invocation: total VMEM footprint ~100 KiB, grid steps would be pure
    # overhead.  (v7x note: for large B, add a "parallel" B-tile grid axis here.)
    return pl.pallas_call(
        moe_fused_kernel,
        out_shape=jax.ShapeDtypeStruct((R, LANE), jnp.float32),
        in_specs=[pl.BlockSpec(memory_space=pltpu.MemorySpace.VMEM) for _ in range(8)],
        out_specs=pl.BlockSpec(memory_space=pltpu.MemorySpace.VMEM),
    )(feat_pad, gate_blk, gsm, comb, wp_fused, bp_fused, wc_stack, bc_stack)


# --------------------------- one-time parameter preparation (cached) ---------------------------

def prepare_params(params, batch_size):
    """Fuse / pad expert weights once; nothing here runs per forward call."""
    w1, b1, w2, b2, emb_table, wp, bp, wc, bc = params
    E, H, C = wc.shape
    R = max(SUB, ((2 * batch_size + SUB - 1) // SUB) * SUB)   # padded row count

    # hstack pooler weights: wp_fused[h_in, e*H + h_out] = wp[e, h_in, h_out]
    wp_fused = jnp.transpose(wp, (1, 0, 2)).reshape(H, E * H)
    bp_fused = jnp.broadcast_to(bp.reshape(1, E * H), (R, E * H)).astype(jnp.float32)

    # vstack classifier weights, zero-padded C -> LANE so stores are lane-dense
    wc_stack = jnp.zeros((E * H, LANE), jnp.float32).at[:, :C].set(wc.reshape(E * H, C))
    bc_stack = jnp.zeros((SUB, LANE), jnp.float32).at[:E, :C].set(bc.reshape(E, C))

    # constant slot-combine matrix: out row b = logits row b + logits row (B + b)
    comb_np = np.zeros((R, R), np.float32)
    for b in range(batch_size):
        comb_np[b, b] = 1.0
        comb_np[b, batch_size + b] = 1.0
    comb = jnp.asarray(comb_np)

    return dict(wp_fused=wp_fused, bp_fused=bp_fused, wc_stack=wc_stack,
                bc_stack=bc_stack, comb=comb, E=E, H=H, C=C, R=R)


# ------------------------------------------ forward ------------------------------------------

def moe_forward(word2vec_features, input_ids, attention_mask, params, prep):
    w1, b1, w2, b2, emb_table = params[:5]
    E, H, C, R = prep['E'], prep['H'], prep['C'], prep['R']
    B = input_ids.shape[0]

    # gating network: Linear -> ReLU -> Linear -> softmax -> top-2 (XLA glue; a Pallas
    # kernel for ~1000 FLOPs is pure launch overhead + an HBM round trip)
    h = jnp.maximum(word2vec_features @ w1 + b1, 0.0)
    probs = jax.nn.softmax(h @ w2 + b2, axis=1)
    top_k_prob, top_k_index = jax.lax.top_k(probs, 2)                   # [B, 2] each

    # synthetic "BERT encoder" stand-in, gathered ONLY for selected experts
    mask = attention_mask.astype(jnp.float32)                           # [B, 2, S]
    emb = emb_table[top_k_index[:, :, None], input_ids]                 # [B, 2, S, H]
    feat = jnp.einsum('bst,bsth->bsh', mask, emb) / mask.sum(-1, keepdims=True)   # [B, 2, H]
    feat2 = jnp.transpose(feat, (1, 0, 2)).reshape(2 * B, H)            # slot-major [2B, H]
    feat_pad = jnp.zeros((R, H), jnp.float32).at[:2 * B].set(feat2)

    # normalized gate weights: fold /total_prob here (exact f32), drop it from the kernel
    total_prob = top_k_prob.sum(1, keepdims=True)                       # [B, 1]
    gn = top_k_prob / total_prob                                        # [B, 2]
    onehot = jax.nn.one_hot(top_k_index, E, dtype=jnp.float32)          # [B, 2, E]
    g2 = jnp.transpose(onehot * gn[:, :, None], (1, 0, 2)).reshape(2 * B, E)      # [2B, E]
    gate_blk = jnp.zeros((R, E * H), jnp.float32).at[:2 * B].set(
        jnp.broadcast_to(g2[:, :, None], (2 * B, E, H)).reshape(2 * B, E * H))
    gsm = jnp.zeros((R, SUB), jnp.float32).at[:2 * B, :E].set(g2)

    out_p = moe_combine(feat_pad, gate_blk, gsm, prep['comb'],
                        prep['wp_fused'], prep['bp_fused'],
                        prep['wc_stack'], prep['bc_stack'])             # [R, LANE]
    return out_p[:B, :C]


# --------------------------- pure-JAX reference (checking) ---------------------------

def reference_forward(word2vec_features, input_ids, attention_mask, params):
    (w1, b1, w2, b2, emb_table, wp, bp, wc, bc) = params
    h = jnp.maximum(word2vec_features @ w1 + b1, 0.0)
    probs = jax.nn.softmax(h @ w2 + b2, axis=1)
    top_k_prob, top_k_index = jax.lax.top_k(probs, 2)
    B = input_ids.shape[0]
    outputs = jnp.zeros((B, NUM_CLASSES), jnp.float32)
    for i in range(2):
        rows = []
        for j in range(B):
            e = top_k_index[j, i]
            m = attention_mask[j, i].astype(jnp.float32)
            ev = emb_table[e][input_ids[j, i]]
            feat = (ev * m[:, None]).sum(0) / m.sum()
            pooled = jnp.tanh(feat @ wp[e] + bp[e][0])
            rows.append(pooled @ wc[e] + bc[e][0])
        outputs = outputs + jnp.stack(rows) * top_k_prob[:, i:i + 1]
    return outputs / top_k_prob.sum(1, keepdims=True)


# ------------------------------------------ main ------------------------------------------

if __name__ == "__main__":
    B, D, S, H, E, C, V = 2, 32, 8, 32, 4, NUM_CLASSES, 50

    key = jax.random.PRNGKey(0)
    ks = jax.random.split(key, 12)

    # deterministic parameter init (stand-in for kaiming / pretrained weights)
    w1 = jax.random.normal(ks[0], (D, 64), jnp.float32) * (2.0 / D) ** 0.5
    b1 = jnp.zeros((1, 64), jnp.float32)
    w2 = jax.random.normal(ks[1], (64, E), jnp.float32) * (2.0 / 64) ** 0.5
    b2 = jnp.zeros((1, E), jnp.float32)
    emb_table = jax.random.normal(ks[2], (E, V, H), jnp.float32) * 0.1
    wp = jax.random.normal(ks[3], (E, H, H), jnp.float32) * (1.0 / H) ** 0.5
    bp = jax.random.normal(ks[4], (E, 1, H), jnp.float32) * 0.01
    wc = jax.random.normal(ks[5], (E, H, C), jnp.float32) * (1.0 / H) ** 0.5
    bc = jax.random.normal(ks[6], (E, 1, C), jnp.float32) * 0.01
    params = (w1, b1, w2, b2, emb_table, wp, bp, wc, bc)

    # one-time weight fusion / padding (cached across forward calls)
    prep = prepare_params(params, B)

    # deterministic example inputs
    word2vec_features = jax.random.normal(ks[7], (B, D), jnp.float32)
    input_ids = jax.random.randint(ks[8], (B, 2, S), 0, V, dtype=jnp.int32)
    attention_mask = (jax.random.uniform(ks[9], (B, 2, S)) > 0.3).astype(jnp.int32)
    attention_mask = attention_mask.at[:, :, 0].set(1)  # at least one valid token

    out = moe_forward(word2vec_features, input_ids, attention_mask, params, prep)
    out = jax.block_until_ready(out)

    ref = reference_forward(word2vec_features, input_ids, attention_mask, params)
    assert out.shape == (B, C)
    assert jnp.allclose(out, ref, atol=1e-4, rtol=1e-4), (out, ref)

    print("KERNEL_OK")
</pallas_src>

<mosaic_0001>
module attributes {stable_mosaic.version = 11 : i64} {
  func.func @moe_fused_kernel(%arg0: memref<8x32xf32, #tpu.memory_space<vmem>>, %arg1: memref<8x128xf32, #tpu.memory_space<vmem>>, %arg2: memref<8x8xf32, #tpu.memory_space<vmem>>, %arg3: memref<8x8xf32, #tpu.memory_space<vmem>>, %arg4: memref<32x128xf32, #tpu.memory_space<vmem>>, %arg5: memref<8x128xf32, #tpu.memory_space<vmem>>, %arg6: memref<128x128xf32, #tpu.memory_space<vmem>>, %arg7: memref<8x128xf32, #tpu.memory_space<vmem>>, %arg8: memref<8x128xf32, #tpu.memory_space<vmem>>) attributes {dimension_semantics = [], scalar_prefetch = 0 : i64, scratch_operands = 0 : i64, tpu.core_type = #tpu.core_type<tc>} {
    %c0 = arith.constant 0 : index
    %c0_0 = arith.constant 0 : index
    %0 = vector.load %arg0[%c0, %c0_0] : memref<8x32xf32, #tpu.memory_space<vmem>>, vector<8x32xf32>
    %c0_1 = arith.constant 0 : index
    %c0_2 = arith.constant 0 : index
    %1 = vector.load %arg4[%c0_1, %c0_2] : memref<32x128xf32, #tpu.memory_space<vmem>>, vector<32x128xf32>
    %cst = arith.constant dense<0.000000e+00> : vector<8x128xf32>
    %2 = tpu.matmul %0, %1, %cst {dimension_numbers = #tpu.dot_dimension_numbers<[1], [0], [0], [1], [0, 0, 1, 1], [], []>} : vector<8x32xf32>, vector<32x128xf32>, vector<8x128xf32> -> vector<8x128xf32>
    %c0_3 = arith.constant 0 : index
    %c0_4 = arith.constant 0 : index
    %3 = vector.load %arg5[%c0_3, %c0_4] : memref<8x128xf32, #tpu.memory_space<vmem>>, vector<8x128xf32>
    %4 = arith.addf %2, %3 : vector<8x128xf32>
    %5 = math.tanh %4 : vector<8x128xf32>
    %c0_5 = arith.constant 0 : index
    %c0_6 = arith.constant 0 : index
    %6 = vector.load %arg1[%c0_5, %c0_6] : memref<8x128xf32, #tpu.memory_space<vmem>>, vector<8x128xf32>
    %7 = arith.mulf %5, %6 : vector<8x128xf32>
    %c0_7 = arith.constant 0 : index
    %c0_8 = arith.constant 0 : index
    %8 = vector.load %arg6[%c0_7, %c0_8] : memref<128x128xf32, #tpu.memory_space<vmem>>, vector<128x128xf32>
    %cst_9 = arith.constant dense<0.000000e+00> : vector<8x128xf32>
    %9 = tpu.matmul %7, %8, %cst_9 {dimension_numbers = #tpu.dot_dimension_numbers<[1], [0], [0], [1], [0, 0, 1, 1], [], []>} : vector<8x128xf32>, vector<128x128xf32>, vector<8x128xf32> -> vector<8x128xf32>
    %c0_10 = arith.constant 0 : index
    %c0_11 = arith.constant 0 : index
    %10 = vector.load %arg2[%c0_10, %c0_11] : memref<8x8xf32, #tpu.memory_space<vmem>>, vector<8x8xf32>
    %c0_12 = arith.constant 0 : index
    %c0_13 = arith.constant 0 : index
    %11 = vector.load %arg7[%c0_12, %c0_13] : memref<8x128xf32, #tpu.memory_space<vmem>>, vector<8x128xf32>
    %cst_14 = arith.constant dense<0.000000e+00> : vector<8x128xf32>
    %12 = tpu.matmul %10, %11, %cst_14 {dimension_numbers = #tpu.dot_dimension_numbers<[1], [0], [0], [1], [0, 0, 1, 1], [], []>} : vector<8x8xf32>, vector<8x128xf32>, vector<8x128xf32> -> vector<8x128xf32>
    %13 = arith.addf %9, %12 : vector<8x128xf32>
    %c0_15 = arith.constant 0 : index
    %c0_16 = arith.constant 0 : index
    %14 = vector.load %arg3[%c0_15, %c0_16] : memref<8x8xf32, #tpu.memory_space<vmem>>, vector<8x8xf32>
    %cst_17 = arith.constant dense<0.000000e+00> : vector<8x128xf32>
    %15 = tpu.matmul %14, %13, %cst_17 {dimension_numbers = #tpu.dot_dimension_numbers<[1], [0], [0], [1], [0, 0, 1, 1], [], []>} : vector<8x8xf32>, vector<8x128xf32>, vector<8x128xf32> -> vector<8x128xf32>
    %c0_18 = arith.constant 0 : index
    %c0_19 = arith.constant 0 : index
    %16 = vector.load %arg8[%c0_18, %c0_19] : memref<8x128xf32, #tpu.memory_space<vmem>>, vector<8x128xf32>
    tpu.vector_store %arg8[%c0_18, %c0_19], %15 {strides = array<i32>} : memref<8x128xf32, #tpu.memory_space<vmem>>, vector<8x128xf32>,
    return
  }
}

</mosaic_0001>

<bundles_post_ra>
// kernel: tpu_custom_call.1
= control target key start
LH: loop header
LB: loop body
LE: loop exit
PB: predicated region body
PF: predicated region fallthrough
CT: control target
= control target key end

     0   :  { %13 = vsyncpa [#allocation3], 0  ;;  %s844_s0 = inlined_call_operand.hbm [shape: f32[8,32], index: 0, kind: input, shape index: {}]   ;;  %s845_s1 = inlined_call_operand.hbm [shape: f32[8,128], index: 1, kind: input, shape index: {}]   ;;  %s846_s2 = inlined_call_operand.hbm [shape: f32[8,8], index: 2, kind: input, shape index: {}]   ;;  %s847_s3 = inlined_call_operand.hbm [shape: f32[8,8], index: 3, kind: input, shape index: {}]   ;;  %s848_s4 = inlined_call_operand.hbm [shape: f32[32,128], index: 4, kind: input, shape index: {}]   ;;  %s849_s5 = inlined_call_operand.vmem [shape: f32[8,128], index: 5, kind: input, shape index: {}]   ;;  %s850_s6 = inlined_call_operand.hbm [shape: f32[128,128], index: 6, kind: input, shape index: {}]   ;;  %s851_s7 = inlined_call_operand.hbm [shape: f32[8,128], index: 7, kind: input, shape index: {}]   ;;  %s852_s8 = inlined_call_operand.hbm [shape: f32[8,128], index: 8, kind: output, shape index: {}]  }
   0x1   :  { %14 = vsyncpa [#allocation6], 0 }
   0x2   :  { %15 = vsyncpa [#allocation9], 0 }
   0x3   :  { %16 = vsyncpa [#allocation12], 0 }
   0x4   :  { %17 = vsyncpa [#allocation4], 0  ;;  %s722_s27 = smov [#allocation5]   ;;  %s723_s29 = smov [#allocation8]  }
   0x5   :  { %s34_s28 = sshll.u32 %s722_s27, 4  ;;  %s54_s30 = sshll.u32 %s723_s29, 4  ;;  %s35_s28 = int_to_ptr.vmem [resolvable:$true] %s34_s28  ;;  %s55_s30 = int_to_ptr.vmem [resolvable:$true] %s54_s30 }
   0x6   :  { %s560_s9 = scalar_lea.vmem %s35_s28, 128  ;;  %p565_p1 = scmp.lt.s32.totalorder %s35_s28, %s35_s28 }
   0x7   :  { %p561_p0 = scmp.ne.s32.totalorder %s35_s28, %s560_s9  ;;  %p566_p2 = scmp.lt.s32.totalorder %s560_s9, %s560_s9 }
   0x9   :  { %p567_p3 = por %p566_p2, %p565_p1 }
   0xb   :  { %p568_p4 = pnand %p567_p3, %p561_p0 }
   0xd   :  { %571 = shalt.err (!%p568_p4)
}
   0xe   :  { %37 = dma.hbm_to_vmem [thread:$0]  %s845_s1, 128, %s35_s28, [#allocation6]  }
   0xf   :  { %s580_s12 = scalar_lea.vmem %s55_s30, 128  ;;  %p585_p6 = scmp.lt.s32.totalorder %s55_s30, %s55_s30 }
  0x10   :  { %p581_p5 = scmp.ne.s32.totalorder %s55_s30, %s580_s12  ;;  %p586_p7 = scmp.lt.s32.totalorder %s580_s12, %s580_s12 }
  0x12   :  { %p587_p8 = por %p586_p7, %p585_p6 }
  0x14   :  { %p588_p9 = pnand %p587_p8, %p581_p5 }
  0x16   :  { %591 = shalt.err (!%p588_p9)
}
  0x17   :  { %57 = dma.hbm_to_vmem [thread:$0]  %s847_s3, 128, %s55_s30, [#allocation9]  }
  0x18   :  { %s724_s15 = smov [#allocation11]   ;;  %s725_s17 = smov [#allocation2]  }
  0x19   :  { %s77_s16 = sshll.u32 %s724_s15, 4  ;;  %s24_s18 = sshll.u32 %s725_s17, 4  ;;  %s78_s16 = int_to_ptr.vmem [resolvable:$true] %s77_s16  ;;  %s25_s18 = int_to_ptr.vmem [resolvable:$true] %s24_s18 }
  0x1a   :  { %s600_s19 = scalar_lea.vmem %s78_s16, 2048  ;;  %p605_p11 = scmp.lt.s32.totalorder %s78_s16, %s78_s16 }
  0x1b   :  { %p601_p10 = scmp.ne.s32.totalorder %s78_s16, %s600_s19  ;;  %p606_p12 = scmp.lt.s32.totalorder %s600_s19, %s600_s19 }
  0x1d   :  { %p607_p13 = por %p606_p12, %p605_p11 }
  0x1f   :  { %p608_p0 = pnand %p607_p13, %p601_p10 }
  0x21   :  { %611 = shalt.err (!%p608_p0)
}
  0x22   :  { %s726_s1 = smov 128   ;;  %s727_s20 = smov 8  }
  0x23   :  { %83 = dma.hbm_to_vmem [thread:$0]  %s850_s6, 2048, %s78_s16, [#allocation12], %s726_s1, %s726_s1, %s727_s20  }
  0x24   :  { %s620_s22 = scalar_lea.vmem %s25_s18, 128  ;;  %p625_p2 = scmp.lt.s32.totalorder %s25_s18, %s25_s18 }
  0x25   :  { %p621_p1 = scmp.ne.s32.totalorder %s25_s18, %s620_s22  ;;  %p626_p3 = scmp.lt.s32.totalorder %s620_s22, %s620_s22 }
  0x27   :  { %p627_p4 = por %p626_p3, %p625_p2 }
  0x29   :  { %p628_p5 = pnand %p627_p4, %p621_p1 }
  0x2b   :  { %631 = shalt.err (!%p628_p5)
}
  0x2c   :  { %27 = dma.hbm_to_vmem [thread:$0]  %s844_s0, 128, %s25_s18, [#allocation3]  }
  0x2d   :  { %s728_s25 = smov [#allocation7]   ;;  %s729_s27 = smov [#allocation10]  }
  0x2e   :  { %s44_s26 = sshll.u32 %s728_s25, 4  ;;  %s63_s28 = sshll.u32 %s729_s27, 4  ;;  %s45_s26 = int_to_ptr.vmem [resolvable:$true] %s44_s26  ;;  %s64_s28 = int_to_ptr.vmem [resolvable:$true] %s63_s28 }
  0x2f   :  { %s640_s29 = scalar_lea.vmem %s45_s26, 128  ;;  %p645_p7 = scmp.lt.s32.totalorder %s45_s26, %s45_s26 }
  0x30   :  { %p641_p6 = scmp.ne.s32.totalorder %s45_s26, %s640_s29  ;;  %p646_p8 = scmp.lt.s32.totalorder %s640_s29, %s640_s29 }
  0x32   :  { %p647_p9 = por %p646_p8, %p645_p7 }
  0x34   :  { %p648_p10 = pnand %p647_p9, %p641_p6 }
  0x36   :  { %651 = shalt.err (!%p648_p10)
}
  0x37   :  { %47 = dma.hbm_to_vmem [thread:$0]  %s846_s2, 128, %s45_s26, [#allocation6]  }
  0x38   :  { %s660_s9 = scalar_lea.vmem %s64_s28, 512  ;;  %p665_p12 = scmp.lt.s32.totalorder %s64_s28, %s64_s28 }
  0x39   :  { %p661_p11 = scmp.ne.s32.totalorder %s64_s28, %s660_s9  ;;  %p666_p13 = scmp.lt.s32.totalorder %s660_s9, %s660_s9 }
  0x3b   :  { %p667_p0 = por %p666_p13, %p665_p12 }
  0x3d   :  { %p668_p1 = pnand %p667_p0, %p661_p11 }
  0x3f   :  { %671 = shalt.err (!%p668_p1)
}
  0x40   :  { %69 = dma.hbm_to_vmem [thread:$0]  %s848_s4, 512, %s64_s28, [#allocation9], %s726_s1, %s726_s1, %s727_s20  }
  0x41   :  { %s730_s11 = smov [#allocation13]  }
  0x42   :  { %s90_s12 = sshll.u32 %s730_s11, 4  ;;  %s91_s12 = int_to_ptr.vmem [resolvable:$true] %s90_s12 }
  0x43   :  { %s680_s13 = scalar_lea.vmem %s91_s12, 128  ;;  %p685_p3 = scmp.lt.s32.totalorder %s91_s12, %s91_s12 }
  0x44   :  { %p681_p2 = scmp.ne.s32.totalorder %s91_s12, %s680_s13  ;;  %p686_p4 = scmp.lt.s32.totalorder %s680_s13, %s680_s13 }
  0x46   :  { %p687_p5 = por %p686_p4, %p685_p3 }
  0x48   :  { %p688_p6 = pnand %p687_p5, %p681_p2 }
  0x4a   :  { %691 = shalt.err (!%p688_p6)
}
  0x4b   :  { %93 = dma.hbm_to_vmem [thread:$0]  %s851_s7, 128, %s91_s12, [#allocation12]  }
  0x4c   :  { %712 = dma.done.wait [#allocation3], 128  }
  0x4d   :  { %713 = vsyncadd [#allocation3], 4294967168 }
  0x4e   :  { %714 = dma.done.wait [#allocation6], 256  }
  0x4f   :  { %715 = vsyncadd [#allocation6], 4294967040 }
  0x50   :  { %716 = dma.done.wait [#allocation9], 640  }
  0x51   :  { %717 = vsyncadd [#allocation9], 4294966656 }
  0x52   :  { %718 = dma.done.wait [#allocation12], 2176  }
  0x53   :  { %719 = vsyncadd [#allocation12], 4294965120  ;;  %v731_v0 = vmov 0.0   ;;  %vm732_vm0 = vmmov 0   ;;  %v119_v1 = vld [vmem:[#allocation10 + $0x18] sm:$0xff]  ;;  %v118_v2 = vld [vmem:[#allocation10 + $0x10] sm:$0xff] }
  0x54   :  { %482 = vmatprep.subr.mxu0 %v731_v0  ;;  %490 = vmatprep.mubr.msk.f32.mxu0 %vm732_vm0, %v731_v0  ;;  %v213_v3 = vld [vmem:[#allocation11 + $0x78] sm:$0xff]  ;;  %v117_v4 = vld [vmem:[#allocation10 + $0x8] sm:$0xff]  ;;  %v212_v5 = vld [vmem:[#allocation11 + $0x70] sm:$0xff]  ;;  %vm121_vm1 = vcmask 261120   ;;  %vm216_vm2 = vcmask 64512   ;;  %s733_s15 = smov [#allocation14]  }
  0x55   :  { %498 = vmatprep.subr.mxu1 %v731_v0  ;;  %530 = vmatprep.mubr.msk.f32.mxu1 %vm732_vm0, %v731_v0  ;;  %v211_v6 = vld [vmem:[#allocation11 + $0x68] sm:$0xff]  ;;  %v116_v7 = vld [vmem:[#allocation10] sm:$0xff]  ;;  %v209_v10 = vld [vmem:[#allocation11 + $0x58] sm:$0xff]  ;;  %s441_s16 = sshll.u32 %s733_s15, 4  ;;  %s442_s16 = int_to_ptr.vmem [resolvable:$true] %s441_s16 }
  0x56   :  { %483 = vmatpush3.msra.mxu0 %v119_v1  ;;  %499 = vmatpush3.msra.mxu1 %v213_v3  ;;  %v115_v8 = vld [vmem:[#allocation2] sm:$0xff]  ;;  %v208_v11 = vld [vmem:[#allocation11 + $0x50] sm:$0xff]  ;;  %v207_v12 = vld [vmem:[#allocation11 + $0x48] sm:$0xff]  ;;  %p697_p8 = scmp.lt.s32.totalorder %s442_s16, %s442_s16 }
  0x57   :  { %484 = vmatprep.subr.mxu0 %v731_v0  ;;  %500 = vmatprep.subr.mxu1 %v731_v0  ;;  %v210_v9 = vld [vmem:[#allocation11 + $0x60] sm:$0xff]  ;;  %v205_v14 = vld [vmem:[#allocation11 + $0x38] sm:$0xff]  ;;  %v204_v15 = vld [vmem:[#allocation11 + $0x30] sm:$0xff] }
  0x58   :  { %485 = vmatpush3.msra.mxu0 %v118_v2  ;;  %501 = vmatpush3.msra.mxu1 %v212_v5  ;;  %v206_v13 = vld [vmem:[#allocation11 + $0x40] sm:$0xff]  ;;  %v203_v16 = vld [vmem:[#allocation11 + $0x28] sm:$0xff]  ;;  %v214_v18 = vld [vmem:[#allocation7] sm:$0xff] }
  0x59   :  { %486 = vmatprep.subr.mxu0 %v731_v0  ;;  %502 = vmatprep.subr.mxu1 %v731_v0  ;;  %v215_v17 = vld [vmem:[#allocation13] sm:$0xff]  ;;  %v201_v20 = vld [vmem:[#allocation11 + $0x18] sm:$0xff]  ;;  %v200_v21 = vld [vmem:[#allocation11 + $0x10] sm:$0xff] }
  0x5a   :  { %487 = vmatpush3.msra.mxu0 %v117_v4  ;;  %503 = vmatpush3.msra.mxu1 %v211_v6  ;;  %v202_v19 = vld [vmem:[#allocation11 + $0x20] sm:$0xff]  ;;  %v199_v22 = vld [vmem:[#allocation11 + $0x8] sm:$0xff]  ;;  %v360_v35 = vld [vmem:[#allocation8] sm:$0xff] }
  0x5b   :  { %488 = vmatprep.subr.mxu0 %v731_v0  ;;  %504 = vmatprep.subr.mxu1 %v731_v0  ;;  %v198_v23 = vld [vmem:[#allocation11] sm:$0xff]  ;;  %v196_v28 = vld [vmem:[#allocation5] sm:$0xff] }
  0x5c   :  { %489 = vmatpush3.msra.mxu0 %v116_v7  ;;  %505 = vmatpush3.msra.mxu1 %v210_v9  ;;  %v120_v24 = vld [vmem:[%s849_s5] sm:$0xff]  ;;  %s692_s5 = scalar_lea.vmem %s442_s16, 128 }
  0x5d   :  { %491 = vmatmul.mubr.msk.f32.vlgmr.msra.gmra.mxu0 %vm121_vm1, %v115_v8  ;;  %506 = vmatprep.subr.mxu1 %v731_v0  ;;  %p693_p7 = scmp.ne.s32.totalorder %s442_s16, %s692_s5  ;;  %p698_p9 = scmp.lt.s32.totalorder %s692_s5, %s692_s5 }
  0x5e   :  { %493 = vmatprep.subr.mxu0 %v731_v0  ;;  %507 = vmatpush3.msra.mxu1 %v209_v10 }
  0x5f   :  { %495 = vmatprep.mubr.msk.f32.mxu0 %vm732_vm0, %v731_v0  ;;  %508 = vmatprep.subr.mxu1 %v731_v0  ;;  %p699_p10 = por %p698_p9, %p697_p8 }
  0x60   :  { %509 = vmatpush3.msra.mxu1 %v208_v11  ;;  %494 = vmatpush3.msra.mxu0 %v215_v17 }
  0x61   :  { %510 = vmatprep.subr.mxu1 %v731_v0  ;;  %496 = vmatmul.mubr.msk.f32.vlgmr.msra.gmra.mxu0 %vm216_vm2, %v214_v18  ;;  %p700_p11 = pnand %p699_p10, %p693_p7 }
  0x62   :  { %511 = vmatpush3.msra.mxu1 %v207_v12  ;;  %533 = vmatprep.subr.mxu0 %v731_v0 }
  0x63   :  { %512 = vmatprep.subr.mxu1 %v731_v0  ;;  %535 = vmatprep.mubr.msk.f32.mxu0 %vm732_vm0, %v731_v0 }
  0x64   :  { %513 = vmatpush3.msra.mxu1 %v206_v13 }
  0x65   :  { %514 = vmatprep.subr.mxu1 %v731_v0 }
  0x66   :  { %515 = vmatpush3.msra.mxu1 %v205_v14 }
  0x67   :  { %516 = vmatprep.subr.mxu1 %v731_v0 }
  0x68   :  { %517 = vmatpush3.msra.mxu1 %v204_v15 }
  0x69   :  { %518 = vmatprep.subr.mxu1 %v731_v0 }
  0x6a   :  { %519 = vmatpush3.msra.mxu1 %v203_v16 }
  0x6b   :  { %520 = vmatprep.subr.mxu1 %v731_v0 }
  0x6c   :  { %521 = vmatpush3.msra.mxu1 %v202_v19 }
  0x6d   :  { %522 = vmatprep.subr.mxu1 %v731_v0 }
  0x6e   :  { %523 = vmatpush3.msra.mxu1 %v201_v20 }
  0x6f   :  { %524 = vmatprep.subr.mxu1 %v731_v0 }
  0x70   :  { %525 = vmatpush3.msra.mxu1 %v200_v21 }
  0x71   :  { %526 = vmatprep.subr.mxu1 %v731_v0 }
  0x72   :  { %527 = vmatpush3.msra.mxu1 %v199_v22 }
  0x73   :  { %528 = vmatprep.subr.mxu1 %v731_v0 }
  0x74   :  { %529 = vmatpush3.msra.mxu1 %v198_v23 }
 0x11d   :  { %v191_v25 = vpop.f32.mrf.mxu0 }
 0x11e   :  { %v192_v26 = vadd.f32 %v191_v25, %v120_v24 }
 0x11f   :  { %v492_v27 = vpop.f32.mrf.mxu0 }
 0x120   :  { %550 = vtanh.f32 %v192_v26 }
 0x121   :  { %v286_v31 = vpop.f32.mrf.mxu0 }
 0x123   :  { %v497_v32 = vpop.f32.mrf.mxu0 }
 0x12d   :  { %v551_v29 = vpop.eup %550 }
 0x12e   :  { %v197_v30 = vmul.f32 %v551_v29, %v196_v28 }
 0x130   :  { %531 = vmatmul.mubr.f32.vlgmr.msra.gmra.mxu1 %v197_v30 }
 0x1f0   :  { %v356_v33 = vpop.f32.mrf.mxu1 }
 0x1f1   :  { %v357_v34 = vadd.f32 %v356_v33, %v286_v31 }
 0x1f2   :  { %v532_v36 = vpop.f32.mrf.mxu1 }
 0x1f3   :  { %534 = vmatpush3.msra.mxu0 %v357_v34 }
 0x1f4   :  { %536 = vmatmul.mubr.msk.f32.vlgmr.msra.gmra.mxu0 %vm216_vm2, %v360_v35 }
 0x2b4   :  { %v430_v37 = vpop.f32.mrf.mxu0 }
 0x2b5   :  { %434 = vst [vmem:[#allocation14] sm:$0xff] %v430_v37 }
 0x2b6   :  { %v537_v38 = vpop.f32.mrf.mxu0 }
 0x2b7   :  { %703 = shalt.err (!%p700_p11)
}
 0x2b8   :  { %444 = dma.vmem_to_hbm [thread:$0]  %s442_s16, 128, %s852_s8, [#allocation4]  }
 0x2b9   :  { %720 = dma.done.wait [#allocation4], 128  }
 0x2ba   :  { %721 = vsyncadd [#allocation4], 4294967168 }
 0x2bb   :  { %448 = vsyncpa [#allocation3], 1 }
 0x2bc   :  { %449 = vsyncpa [#allocation6], 1 }
 0x2bd   :  { %450 = vsyncpa [#allocation9], 1 }
 0x2be   :  { %451 = vsyncpa [#allocation12], 1 }
 0x2bf   :  { %452 = vsyncpa [#allocation4], 1 }

</bundles_post_ra>
